<compile_context>
chip_gen: v6e
topology: v6e:2x2x1
jax: 0.10.0
libtpu: 0.0.40
codegen_flags: <defaults>
</compile_context>

<pallas_src>
import functools

import jax
import jax.numpy as jnp
from jax.experimental import pallas as pl
from jax.experimental.pallas import tpu as pltpu


def _soft_target_ce_kernel(x_ref, t_ref, loss_ref, *, n_rows, tile_n,
                           targets_sum_to_one):
    # x_ref, t_ref: (tile_n, C) VMEM blocks; loss_ref: (tile_n, 1) per-row losses.
    x_raw = x_ref[...]
    t_raw = t_ref[...]

    # Row max in the input dtype (exact; avoids an extra full-tile f32 pass for
    # bf16 inputs on v6e/v7x), widened only where f32 is needed.
    m = jnp.max(x_raw, axis=-1, keepdims=True).astype(jnp.float32)   # (tile_n, 1)
    x = x_raw.astype(jnp.float32)
    t = t_raw.astype(jnp.float32)

    # logsumexp(x, axis=-1), numerically stable.
    lse = jnp.log(jnp.sum(jnp.exp(x - m), axis=-1, keepdims=True)) + m  # (tile_n, 1)

    # sum_c(-t * (x - lse)) == sum_c(t) * lse - sum_c(t * x)
    tx_sum = jnp.sum(t * x, axis=-1, keepdims=True)                  # (tile_n, 1)
    if targets_sum_to_one:
        loss = lse - tx_sum
    else:
        t_sum = jnp.sum(t, axis=-1, keepdims=True)                   # (tile_n, 1)
        loss = t_sum * lse - tx_sum

    # Ragged last tile: rows past the real batch may contain garbage (possibly
    # Inf/NaN) logits.  Use a select (does not propagate NaN from the unselected
    # branch) to zero them before the store.
    row = pl.program_id(0) * tile_n + jax.lax.broadcasted_iota(
        jnp.int32, (tile_n, 1), 0)
    loss_ref[...] = jnp.where(row < n_rows, loss, jnp.float32(0.0))


def _round_up(a: int, b: int) -> int:
    return (a + b - 1) // b * b


def _pick_tile_n(n, c, x_itemsize, t_itemsize, row_align, vmem_budget_bytes):
    # Per batch-row VMEM cost:
    #   * 2 pipeline buffers for each of the two (tile_n, C) inputs (narrow dtype)
    #   * ~4 f32 (tile_n, C) kernel temporaries (x_f32, t_f32, exp(x-m), t*x)
    bytes_per_row = 2 * c * (x_itemsize + t_itemsize) + 4 * 4 * c
    tile_n = max(row_align, vmem_budget_bytes // max(bytes_per_row, 1))
    tile_n = (tile_n // row_align) * row_align
    tile_n = min(tile_n, 1024)  # diminishing returns past ~1K rows per step

    # Keep >= ~4 grid steps when the batch permits so dimension_semantics
    # ("parallel",) can actually shard across v7x's two TensorCores.
    quarter = _round_up(max(1, (n + 3) // 4), row_align)
    tile_n = min(tile_n, quarter)
    return max(tile_n, row_align)


def soft_target_cross_entropy(x: jax.Array, target: jax.Array, *,
                              targets_sum_to_one: bool = False) -> jax.Array:
    """Pallas TPU implementation of timm's SoftTargetCrossEntropy forward (f32)."""
    assert x.shape == target.shape and x.ndim == 2
    n, c = x.shape

    # Sublane packing: 8 rows per vreg for 32-bit dtypes, 16 for 16-bit.
    row_align = 16 if jnp.dtype(x.dtype).itemsize < 4 else 8

    # Derive the VMEM budget from the actual chip (v5e/v6e: 128 MiB, v7x: 64 MiB)
    # and leave headroom for compiler-managed scratch.
    try:
        vmem_physical = pltpu.get_tpu_info().vmem_capacity_bytes
    except Exception:
        vmem_physical = 64 * 1024 * 1024  # conservative (v7x-sized) fallback
    vmem_limit_bytes = int(vmem_physical * 3 // 4)
    tile_budget_bytes = int(vmem_limit_bytes * 0.9)

    tile_n = _pick_tile_n(
        n, c,
        jnp.dtype(x.dtype).itemsize, jnp.dtype(target.dtype).itemsize,
        row_align, tile_budget_bytes)

    grid = (pl.cdiv(n, tile_n),)  # ragged last tile handled in-kernel, no padding

    kernel = functools.partial(
        _soft_target_ce_kernel,
        n_rows=n, tile_n=tile_n, targets_sum_to_one=targets_sum_to_one)

    # TODO(synk): for vocab-scale C (>8K) add a second grid axis over C with an
    # online/streaming logsumexp; for tiny C (<128) rows could be folded into
    # lanes host-side to recover lane utilization.
    per_row_loss = pl.pallas_call(
        kernel,
        out_shape=jax.ShapeDtypeStruct((n, 1), jnp.float32),
        grid=grid,
        in_specs=[
            pl.BlockSpec((tile_n, c), lambda i: (i, 0)),
            pl.BlockSpec((tile_n, c), lambda i: (i, 0)),
        ],
        out_specs=pl.BlockSpec((tile_n, 1), lambda i: (i, 0)),
        compiler_params=pltpu.CompilerParams(
            dimension_semantics=("parallel",),  # independent tiles -> megacore
            vmem_limit_bytes=vmem_limit_bytes,
        ),
    )(x, target)

    # Tiny final reduction + mean in f32 (invalid rows were stored as exact 0).
    return jnp.sum(per_row_loss) / jnp.float32(n)


def _reference(x, target):
    log_p = jax.nn.log_softmax(x.astype(jnp.float32), axis=-1)
    loss = jnp.sum(-target.astype(jnp.float32) * log_p, axis=-1)
    return loss.mean()


if __name__ == "__main__":
    key = jax.random.PRNGKey(0)
    k1, k2 = jax.random.split(key)

    # Small shapes consistent with the module: batch of soft-labelled rows.
    N, C = 16, 64
    x = jax.random.normal(k1, (N, C), dtype=jnp.float32)
    target = jax.nn.softmax(jax.random.normal(k2, (N, C), dtype=jnp.float32), axis=-1)

    loss = jax.block_until_ready(soft_target_cross_entropy(x, target))
    ref = _reference(x, target)
    assert jnp.allclose(loss, ref, atol=1e-5, rtol=1e-5), (loss, ref)

    # Ragged batch (n % tile_n != 0) exercises the no-pad / masked-last-tile path.
    Nr = 13
    xr, tr = x[:Nr], target[:Nr]
    loss_r = jax.block_until_ready(soft_target_cross_entropy(xr, tr))
    ref_r = _reference(xr, tr)
    assert jnp.allclose(loss_r, ref_r, atol=1e-5, rtol=1e-5), (loss_r, ref_r)

    print("KERNEL_OK")
</pallas_src>

<mosaic_0001>
module attributes {stable_mosaic.version = 11 : i64} {
  func.func @_soft_target_ce_kernel(%arg0: i32, %arg1: memref<8x64xf32, #tpu.memory_space<vmem>>, %arg2: memref<8x64xf32, #tpu.memory_space<vmem>>, %arg3: memref<8x1xf32, #tpu.memory_space<vmem>>) attributes {dimension_semantics = [#tpu.dimension_semantics<parallel>], iteration_bounds = array<i64: 2>, scalar_prefetch = 0 : i64, scratch_operands = 0 : i64, tpu.core_type = #tpu.core_type<tc>, window_params = [{transform_indices = @transform_0, window_bounds = array<i64: 8, 64>}, {transform_indices = @transform_1, window_bounds = array<i64: 8, 64>}, {transform_indices = @transform_2, window_bounds = array<i64: 8, 1>}]} {
    %c0 = arith.constant 0 : index
    %c0_0 = arith.constant 0 : index
    %0 = vector.load %arg1[%c0, %c0_0] : memref<8x64xf32, #tpu.memory_space<vmem>>, vector<8x64xf32>
    %c0_1 = arith.constant 0 : index
    %c0_2 = arith.constant 0 : index
    %1 = vector.load %arg2[%c0_1, %c0_2] : memref<8x64xf32, #tpu.memory_space<vmem>>, vector<8x64xf32>
    %cst = arith.constant dense<0xFF800000> : vector<8xf32>
    %2 = vector.multi_reduction <maximumf>, %0, %cst [1] : vector<8x64xf32> to vector<8xf32>
    %3 = vector.shape_cast %2 : vector<8xf32> to vector<8x1xf32>
    %4 = vector.broadcast %3 : vector<8x1xf32> to vector<8x64xf32>
    %5 = arith.subf %0, %4 : vector<8x64xf32>
    %6 = math.exp %5 : vector<8x64xf32>
    %cst_3 = arith.constant dense<0.000000e+00> : vector<8xf32>
    %7 = vector.multi_reduction <add>, %6, %cst_3 [1] : vector<8x64xf32> to vector<8xf32>
    %8 = vector.shape_cast %7 : vector<8xf32> to vector<8x1xf32>
    %9 = math.log %8 : vector<8x1xf32>
    %10 = arith.addf %9, %3 : vector<8x1xf32>
    %11 = arith.mulf %1, %0 : vector<8x64xf32>
    %cst_4 = arith.constant dense<0.000000e+00> : vector<8xf32>
    %12 = vector.multi_reduction <add>, %11, %cst_4 [1] : vector<8x64xf32> to vector<8xf32>
    %13 = vector.shape_cast %12 : vector<8xf32> to vector<8x1xf32>
    %cst_5 = arith.constant dense<0.000000e+00> : vector<8xf32>
    %14 = vector.multi_reduction <add>, %1, %cst_5 [1] : vector<8x64xf32> to vector<8xf32>
    %15 = vector.shape_cast %14 : vector<8xf32> to vector<8x1xf32>
    %16 = arith.mulf %15, %10 : vector<8x1xf32>
    %17 = arith.subf %16, %13 : vector<8x1xf32>
    %c8_i32 = arith.constant 8 : i32
    %18 = arith.muli %arg0, %c8_i32 : i32
    %19 = tpu.iota {dimensions = array<i32: 0>} : vector<8x1xi32>
    %20 = vector.broadcast %18 : i32 to vector<8x1xi32>
    %21 = arith.addi %20, %19 : vector<8x1xi32>
    %c16_i32 = arith.constant 16 : i32
    %22 = vector.broadcast %c16_i32 : i32 to vector<8x1xi32>
    %23 = arith.cmpi slt, %21, %22 : vector<8x1xi32>
    %cst_6 = arith.constant 0.000000e+00 : f32
    %24 = vector.broadcast %cst_6 : f32 to vector<8x1xf32>
    %25 = arith.select %23, %17, %24 : vector<8x1xi1>, vector<8x1xf32>
    %c0_7 = arith.constant 0 : index
    %c0_8 = arith.constant 0 : index
    %26 = vector.load %arg3[%c0_7, %c0_8] : memref<8x1xf32, #tpu.memory_space<vmem>>, vector<8x1xf32>
    tpu.vector_store %arg3[%c0_7, %c0_8], %25 {strides = array<i32>} : memref<8x1xf32, #tpu.memory_space<vmem>>, vector<8x1xf32>,
    return
  }
  func.func @transform_0(%arg0: i32) -> (i32, i32) {
    %c0_i32 = arith.constant 0 : i32
    %c0_i32_0 = arith.constant 0 : i32
    return %arg0, %c0_i32 : i32, i32
  }
  func.func @transform_1(%arg0: i32) -> (i32, i32) {
    %c0_i32 = arith.constant 0 : i32
    %c0_i32_0 = arith.constant 0 : i32
    return %arg0, %c0_i32 : i32, i32
  }
  func.func @transform_2(%arg0: i32) -> (i32, i32) {
    %c0_i32 = arith.constant 0 : i32
    %c0_i32_0 = arith.constant 0 : i32
    return %arg0, %c0_i32 : i32, i32
  }
}

</mosaic_0001>

<bundles_post_ra>
// kernel: tpu_custom_call.1
= control target key start
LH: loop header
LB: loop body
LE: loop exit
PB: predicated region body
PF: predicated region fallthrough
CT: control target
= control target key end

     0   :  { %7 = vsyncpa [#allocation3], 0  ;;  %s645_s0 = inlined_call_operand.hbm [shape: f32[16,64], index: 0, kind: input, shape index: {}]   ;;  %s646_s1 = inlined_call_operand.hbm [shape: f32[16,64], index: 1, kind: input, shape index: {}]   ;;  %s647_s2 = inlined_call_operand.vmem [shape: f32[16,1], index: 2, kind: output, shape index: {}]  }
   0x1   :  { %9 = vsyncpa [#allocation3 + $0x1], 0 }
   0x2   :  { %10 = vsyncpa [#allocation5], 0 }
   0x3   :  { %12 = vsyncpa [#allocation5 + $0x1], 0  ;;  %s492_s9 = smov 0   ;;  %s494_s10 = smov 0  }
   0x4   :  { %s496_s11 = smov 0   ;;  %s498_s12 = smov 0  }
   0x5 LB: > { %s511_s13 = sadd.s32 4294967295, %s473_s12   ;;  %s514_s14 = sadd.s32 1, %s473_s12   ;;  %s473_s12 = sphi %s498_s12, %s659_s12   ;;  %s469_s11 = sphi %s496_s11, %s658_s11   ;;  %s465_s10 = sphi %s494_s10, %s657_s10   ;;  %s461_s9 = sphi %s492_s9, %s656_s9  }
   0x6   : > { %s22_s15 = ssub.s32 %s473_s12, %s514_s14  ;;  %s25_s16 = sadd.s32 1, %s469_s11 }
   0x7   : > { %p23_p0 = scmp.eq.s32.totalorder %s22_s15, 0  ;;  %p32_p1 = scmp.ne.s32.totalorder %s469_s11, %s465_s10 }
   0x8   : > { %p33_p2 = scmp.eq.s32.totalorder %s473_s12, 0  ;;  %p38_p3 = scmp.ne.s32.totalorder %s465_s10, %s461_s9 }
   0x9   : > { %s524_s17 = scalar_select %p23_p0, %s469_s11, %s25_s16  }
   0xa   : > { %p34_p4 = por %p33_p2, %p32_p1  ;;  %p39_p5 = scmp.eq.s32.totalorder %s511_s13, 0 }
   0xb   : > { %p342_p6 = scmp.lt.s32.totalorder %s473_s12, 2  ;;  %s533_s19 = sand.u32 1, %s469_s11  }
   0xc   : > { %p528_p7 = por %p39_p5, %p38_p3  ;;  %s320_s20 = sshll.u32 %s533_s19, 3 }
   0xd   : > { %s321_s21 = sshll.u32 %s473_s12, 7  ;;  %s118_s25 = scalar_lea.vmem [#allocation2], %s320_s20 }
   0xe   : > { %s649_s18 = scalar_select %p528_p7, 1, 0 }
   0xf   : > { %s542_s24 = scalar_lea.hbm %s645_s0, %s321_s21  ;;  %s125_s26 = sshll.u32 %s118_s25, 4  ;;  %s546_s26 = int_to_ptr.vmem [resolvable:$true] %s125_s26 }
  0x10   : > { %p548_p8 = pnand %p342_p6, %p34_p4  ;;  %s115_s28 = scalar_lea.sflag [#allocation3], %s533_s19 }
  0x11   : > { %s379_s29 = scalar_lea.hbm %s542_s24, 128  ;;  %s384_s4 = scalar_lea.hbm %s645_s0, 256 }
  0x12   : > { %p380_p11 = scmp.ne.s32.totalorder %s542_s24, %s379_s29  ;;  %p381_p12 = pneg %p548_p8 }
  0x13   : > { %p385_p1 = scmp.lt.s32.totalorder %s542_s24, %s645_s0  ;;  %p386_p2 = scmp.lt.s32.totalorder %s384_s4, %s379_s29 }
  0x14   : > { %p382_p13 = pnand %p381_p12, %p380_p11 }
  0x15   : > { %p387_p3 = por %p386_p2, %p385_p1 }
  0x16   : > { %p383_p0 = pneg %p382_p13 }
  0x18   : > { %p388_p4 = pnand %p387_p3, %p383_p0 }
  0x1a   : > { %391 = shalt.err (!%p388_p4)
}
  0x1b   : > { %s392_s7 = scalar_lea.vmem %s546_s26, 128  ;;  %s475_s8 = smov [#allocation2]  }
  0x1c   : > { %p393_p5 = scmp.ne.s32.totalorder %s546_s26, %s392_s7  ;;  %s397_s9 = sshll.u32 %s475_s8, 4  ;;  %s398_s9 = int_to_ptr.vmem [resolvable:$false] %s397_s9 }
  0x1d   : > { %s399_s15 = scalar_lea.vmem %s398_s9, 256  ;;  %p400_p13 = scmp.lt.s32.totalorder %s546_s26, %s398_s9 }
  0x1e   : > { %p395_p6 = pnand %p393_p5, %p381_p12  ;;  %p401_p9 = scmp.lt.s32.totalorder %s399_s15, %s392_s7 }
  0x20   : > { %p396_p11 = pneg %p395_p6  ;;  %p402_p10 = por %p401_p9, %p400_p13 }
  0x22   : > { %p403_p1 = pnand %p402_p10, %p396_p11 }
  0x24   : > { %406 = shalt.err (!%p403_p1)
}
  0x25   : > { %338 = dma.hbm_to_vmem [thread:$0]  (!%p548_p8), %s542_s24, 128, %s546_s26, %s115_s28  }
  0x26   : > { %p651_p0 = scmp.lt.s32.totalorder %s473_s12, 3  ;;  %p652_p2 = scmp.ge.s32.totalorder %s473_s12, 1 }
  0x27   : > { %s592_s25 = scalar_lea.hbm %s646_s1, %s321_s21  ;;  %s136_s29 = scalar_lea.vmem [#allocation4], %s320_s20 }
  0x28   : > { %p583_p3 = pnand %p652_p2, %p651_p0  ;;  %s143_s30 = sshll.u32 %s136_s29, 4  ;;  %s144_s30 = int_to_ptr.vmem [resolvable:$true] %s143_s30 }
  0x29   : > { %s133_s24 = scalar_lea.sflag [#allocation5], %s533_s19  ;;  %s407_s26 = scalar_lea.hbm %s592_s25, 128 }
  0x2a   : > { %s653_s16 = scalar_select %p583_p3, 1, 0 }
  0x2b   : > { %p408_p9 = scmp.ne.s32.totalorder %s592_s25, %s407_s26  ;;  %s412_s3 = scalar_lea.hbm %s646_s1, 256 }
  0x2c   : > { %p413_p5 = scmp.lt.s32.totalorder %s592_s25, %s646_s1  ;;  %p414_p6 = scmp.lt.s32.totalorder %s412_s3, %s407_s26 }
  0x2d   : > { %p410_p10 = pnand %p408_p9, %p381_p12 }
  0x2e   : > { %p415_p11 = por %p414_p6, %p413_p5 }
  0x2f   : > { %p411_p4 = pneg %p410_p10 }
  0x31   : > { %p416_p13 = pnand %p415_p11, %p411_p4 }
  0x33   : > { %419 = shalt.err (!%p416_p13)
}
  0x34   : > { %s420_s20 = scalar_lea.vmem %s144_s30, 128  ;;  %s476_s19 = smov [#allocation4]  }
  0x35   : > { %p421_p1 = scmp.ne.s32.totalorder %s144_s30, %s420_s20  ;;  %s425_s5 = sshll.u32 %s476_s19, 4  ;;  %s426_s5 = int_to_ptr.vmem [resolvable:$false] %s425_s5 }
  0x36   : > { %s427_s6 = scalar_lea.vmem %s426_s5, 256  ;;  %p428_p9 = scmp.lt.s32.totalorder %s144_s30, %s426_s5 }
  0x37   : > { %p423_p0 = pnand %p421_p1, %p381_p12  ;;  %p429_p10 = scmp.lt.s32.totalorder %s427_s6, %s420_s20 }
  0x39   : > { %p424_p2 = pneg %p423_p0  ;;  %p430_p7 = por %p429_p10, %p428_p9 }
  0x3b   : > { %p431_p3 = pnand %p430_p7, %p424_p2 }
  0x3d   : > { %434 = shalt.err (!%p431_p3)
}
  0x3e   : > { %341 = dma.hbm_to_vmem [thread:$0]  (!%p548_p8), %s592_s25, 128, %s144_s30, %s133_s24  }
  0x3f   : > { %p654_p4 = scmp.ne.s32.totalorder %s653_s16, 0 }
  0x40   : > { %s154_s7 = sand.u32 (!%p654_p4), 1, %s465_s10   ;;  %p655_p12 = scmp.ne.s32.totalorder (!%p654_p4), %s649_s18, 0 }
  0x41   : > { %152 = sbr.rel (%p654_p4) target bundleno = 394 (0x18a), region = 28  ;;  %s325_s8 = sshll.u32 (!%p654_p4), %s154_s7, 3 }
  0x42   : > { %s155_s9 = scalar_lea.sflag (!%p654_p4), [#allocation3], %s154_s7  ;;  %s158_s15 = scalar_lea.vmem (!%p654_p4), [#allocation2], %s325_s8 }
  0x46   : > { %452 = dma.done.wait (%p655_p12), %s155_s9, 128  }
  0x47   : > { %454 = vsyncadd (%p655_p12), %s155_s9, 4294967168  ;;  %s164_s22 = scalar_lea.sflag [#allocation5], %s154_s7  ;;  %s167_s23 = scalar_lea.vmem [#allocation4], %s325_s8 }
  0x48   : > { %456 = dma.done.wait (%p655_p12), %s164_s22, 128  }
  0x49   : > { %458 = vsyncadd (%p655_p12), %s164_s22, 4294967168  ;;  %vm198_vm0 = vcmask 523264   ;;  %v196_v0 = vld [vmem:[%s158_s15] sm:$0xff]  ;;  %v197_v2 = vld [vmem:[%s167_s23] sm:$0xff]  ;;  %v221_v12 = vlaneseq  ;;  %p192_p7 = scmp.lt.s32.totalorder %s511_s13, 1  ;;  %s328_s18 = sshll.u32 %s511_s13, 3 }
  0x4a   : > { %v199_v1 = vsel %vm198_vm0, %v196_v0, -inf  ;;  %v215_v3 = vsel %vm198_vm0, %v197_v2, 0.0  ;;  %v211_v4 = vmul.f32 %v197_v2, %v196_v0  ;;  %v223_v15 = vstv %s328_s18 }
  0x4b   : > { %200 = vmax.xlane.f32.xlu0 %v199_v1  ;;  %216 = vadd.xlane.f32.xlu1 %v215_v3  ;;  %v222_v14 = vshrl.u32 %v221_v12, 7  ;;  %s661_s13 = smov (!%p192_p7, %s511_s13), 1  ;;  %vm227_vm2 = vcmask 7168  }
  0x4c   : > { %v212_v5 = vsel %vm198_vm0, %v211_v4, 0.0  ;;  %s327_s27 = sshll.u32 %s661_s13, 3 }
  0x4d   : > { %v224_v18 = vadd.s32 %v223_v15, %v222_v14  ;;  %s195_s29 = scalar_lea.vmem %s647_s2, %s327_s27 }
  0x4f   : > { %213 = vadd.xlane.f32.xlu1 %v212_v5  ;;  %vm225_vm1 = vcmp.lt.s32.totalorder %v224_v18, 16 }
  0xd4   : > { %v201_v6 = vpop.xlane.xlu0 %200  ;;  %v217_v13 = vpop.xlane.xlu1 %216 }
  0xd5   : > { %v202_v7 = vsub.f32 %v196_v0, %v201_v6 }
  0xd7   : > { %v203_v8 = vmul.f32 1.442695, %v202_v7 }
  0xd8   : > { %v214_v20 = vpop.xlane.xlu1 %213 }
  0xd9   : > { %375 = vpow2.f32 %v203_v8 }
  0xe6   : > { %v376_v9 = vpop.eup %375 }
  0xe7   : > { %v205_v10 = vsel %vm198_vm0, %v376_v9, 0.0 }
  0xe8   : > { %206 = vadd.xlane.f32.xlu0 %v205_v10 }
 0x171   : > { %v207_v11 = vpop.xlane.xlu0 %206 }
 0x172   : > { %377 = vlog2.f32 %v207_v11 }
 0x17f   : > { %v378_v16 = vpop.eup %377 }
 0x180   : > { %v209_v17 = vmul.f32 0.6931472, %v378_v16 }
 0x182   : > { %v210_v19 = vadd.f32 %v209_v17, %v201_v6 }
 0x184   : > { %v218_v21 = vmul.f32 %v217_v13, %v210_v19 }
 0x186   : > { %v219_v22 = vsub.f32 %v218_v21, %v214_v20 }
 0x188   : > { %v226_v23 = vsel %vm225_vm1, %v219_v22, 0.0 }
 0x189   : > { %228 = vst.msk [vmem:[%s195_s29] sm:$0xff] %vm227_vm2, %v226_v23 }
 0x18a PF: > { %p15_p8 = scmp.ge.s32.totalorder %s514_s14, 4   ;;  %s656_s9 = smov %s465_s10 }
 0x18b   : > { %s657_s10 = smov %s469_s11  ;;  %s658_s11 = smov %s524_s17 }
 0x18c   : > { %s659_s12 = smov %s514_s14  ;;  %17 = sbr.rel (!%p15_p8) target bundleno = 5 (0x5), region = 81 }
 0x191   :  { %248 = vsyncpa [#allocation3], 1 }
 0x192   :  { %250 = vsyncpa [#allocation3 + $0x1], 1 }
 0x193   :  { %251 = vsyncpa [#allocation5], 1 }
 0x194   :  { %253 = vsyncpa [#allocation5 + $0x1], 1 }

</bundles_post_ra>
